<compile_context>
chip_gen: v5e
topology: v5e:2x2
jax: 0.10.0
libtpu: 0.0.40
codegen_flags: <defaults>
</compile_context>

<pallas_src>
import jax
import jax.numpy as jnp
from jax.experimental import pallas as pl
from jax.experimental.pallas import tpu as pltpu


def _pop_linear_kernel_acc(x_ref, w_ref, o_ref, acc_ref):
    # x_ref: (TP, B, TIN), w_ref: (TP, TIN, TOUT), o_ref: (TP, B, TOUT)
    # acc_ref: (TP, B, TOUT) f32 scratch, resident across the IN (k) axis.
    @pl.when(pl.program_id(2) == 0)
    def _():
        acc_ref[...] = jnp.zeros_like(acc_ref)

    # Batched matmul over the pop dimension; f32 accumulation on the MXU.
    acc_ref[...] += jnp.einsum(
        "pbi,pio->pbo",
        x_ref[...],
        w_ref[...],
        preferred_element_type=jnp.float32,
    )

    @pl.when(pl.program_id(2) == pl.num_programs(2) - 1)
    def _():
        o_ref[...] = acc_ref[...].astype(o_ref.dtype)


def _pop_linear_kernel_noacc(x_ref, w_ref, o_ref):
    # Single IN tile: write directly, no scratch / init / finalize overhead.
    o_ref[...] = jnp.einsum(
        "pbi,pio->pbo",
        x_ref[...],
        w_ref[...],
        preferred_element_type=jnp.float32,
    ).astype(o_ref.dtype)


def _pick_feature_tile(dim: int, max_tile: int = 512) -> int:
    """Full dim when small; otherwise the largest 128-multiple divisor <= max_tile."""
    if dim <= max(max_tile, 1024):
        return dim
    t = max_tile
    while t >= 128:
        if dim % t == 0:
            return t
        t -= 128
    return dim  # no aligned divisor -> fall back to the full dim (correct, just big)


def pop_linear(
    x: jax.Array,
    w: jax.Array,
    *,
    tp: int | None = None,
    t_in: int | None = None,
    t_out: int | None = None,
) -> jax.Array:
    """x: (P, B, IN), w: (P, IN, OUT) -> (P, B, OUT)."""
    P, B, IN = x.shape
    Pw, IN2, OUT = w.shape
    assert P == Pw and IN == IN2

    out_dtype = x.dtype  # module output dtype follows the input

    # ---- Tile selection -----------------------------------------------------
    if t_in is None:
        t_in = _pick_feature_tile(IN)
    if t_out is None:
        t_out = _pick_feature_tile(OUT)
    assert IN % t_in == 0 and OUT % t_out == 0

    # Pack as many pop members per step as fit a conservative VMEM budget
    # (2x double-buffered x/w/out blocks + f32 accumulator).
    x_item = jnp.dtype(x.dtype).itemsize
    w_item = jnp.dtype(w.dtype).itemsize
    o_item = jnp.dtype(out_dtype).itemsize
    per_pop_bytes = (
        2 * (B * t_in * x_item + t_in * t_out * w_item + B * t_out * o_item)
        + B * t_out * 4  # f32 accumulator (only present on the acc path)
    )
    if tp is None:
        budget = 24 * 1024 * 1024  # comfortable even on v7x (64 MiB physical VMEM)
        tp = max(1, min(P, budget // max(per_pop_bytes, 1)))
        while P % tp != 0:
            tp -= 1
    assert P % tp == 0

    n_p, n_out, n_in = P // tp, OUT // t_out, IN // t_in

    # VMEM needed for the chosen blocks (+ headroom); the default scoped limit
    # (16/32 MiB) would otherwise reject the larger tiles.
    vmem_needed = tp * per_pop_bytes
    vmem_limit = int(min(100 * 1024 * 1024, max(32 * 1024 * 1024, 2 * vmem_needed)))

    cost = pl.CostEstimate(
        flops=2 * P * B * IN * OUT,
        bytes_accessed=x_item * P * B * IN + w_item * P * IN * OUT + o_item * P * B * OUT,
        transcendentals=0,
    )

    in_specs = [
        pl.BlockSpec((tp, B, t_in), lambda p, n, k: (p, 0, k)),
        pl.BlockSpec((tp, t_in, t_out), lambda p, n, k: (p, k, n)),
    ]
    out_specs = pl.BlockSpec((tp, B, t_out), lambda p, n, k: (p, 0, n))

    if n_in == 1:
        kernel = _pop_linear_kernel_noacc
        scratch_shapes = []
    else:
        kernel = _pop_linear_kernel_acc
        scratch_shapes = [pltpu.VMEM((tp, B, t_out), jnp.float32)]

    grid_spec = pltpu.PrefetchScalarGridSpec(
        num_scalar_prefetch=0,
        grid=(n_p, n_out, n_in),
        in_specs=in_specs,
        out_specs=out_specs,
        scratch_shapes=scratch_shapes,
    )

    return pl.pallas_call(
        kernel,
        out_shape=jax.ShapeDtypeStruct((P, B, OUT), out_dtype),
        grid_spec=grid_spec,
        compiler_params=pltpu.CompilerParams(
            dimension_semantics=("parallel", "parallel", "arbitrary"),
            vmem_limit_bytes=vmem_limit,
        ),
        cost_estimate=cost,
    )(x, w)


if __name__ == "__main__":
    key = jax.random.PRNGKey(0)
    kx, kw = jax.random.split(key)

    pop_size, batch, in_features, out_features = 4, 8, 32, 16

    # Deterministic parameter init mirroring torch.randn(...) * 0.1
    w = jax.random.normal(kw, (pop_size, in_features, out_features), jnp.float32) * 0.1
    x = jax.random.normal(kx, (pop_size, batch, in_features), jnp.float32)

    ref = jnp.einsum("pbi,pio->pbo", x, w)

    out = pop_linear(x, w)
    out = jax.block_until_ready(out)
    assert out.shape == (pop_size, batch, out_features)
    assert out.dtype == jnp.float32
    assert jnp.allclose(out, ref, atol=1e-5, rtol=1e-5)

    # Exercise the multi-IN-tile (accumulator) path as well, still at tiny cost.
    out2 = pop_linear(x, w, t_in=in_features // 2)
    out2 = jax.block_until_ready(out2)
    assert jnp.allclose(out2, ref, atol=1e-5, rtol=1e-5)

    print("KERNEL_OK")
</pallas_src>

<mosaic_0001>
module attributes {stable_mosaic.version = 11 : i64} {
  func.func @_pop_linear_kernel_noacc(%arg0: i32, %arg1: i32, %arg2: i32, %arg3: memref<4x8x32xf32, #tpu.memory_space<vmem>>, %arg4: memref<4x32x16xf32, #tpu.memory_space<vmem>>, %arg5: memref<4x8x16xf32, #tpu.memory_space<vmem>>) attributes {dimension_semantics = [#tpu.dimension_semantics<parallel>, #tpu.dimension_semantics<parallel>, #tpu.dimension_semantics<arbitrary>], iteration_bounds = array<i64: 1, 1, 1>, scalar_prefetch = 0 : i64, scratch_operands = 0 : i64, tpu.core_type = #tpu.core_type<tc>, window_params = [{transform_indices = @transform_0, window_bounds = array<i64: 4, 8, 32>}, {transform_indices = @transform_1, window_bounds = array<i64: 4, 32, 16>}, {transform_indices = @transform_2, window_bounds = array<i64: 4, 8, 16>}]} {
    %c0 = arith.constant 0 : index
    %c0_0 = arith.constant 0 : index
    %c0_1 = arith.constant 0 : index
    %0 = vector.load %arg3[%c0, %c0_0, %c0_1] : memref<4x8x32xf32, #tpu.memory_space<vmem>>, vector<4x8x32xf32>
    %c0_2 = arith.constant 0 : index
    %c0_3 = arith.constant 0 : index
    %c0_4 = arith.constant 0 : index
    %1 = vector.load %arg4[%c0_2, %c0_3, %c0_4] : memref<4x32x16xf32, #tpu.memory_space<vmem>>, vector<4x32x16xf32>
    "tpu.trace_start"() <{level = 10 : i32, message = "pbi,pio->pbo"}> : () -> ()
    %cst = arith.constant dense<0.000000e+00> : vector<4x8x16xf32>
    %2 = tpu.matmul %0, %1, %cst {dimension_numbers = #tpu.dot_dimension_numbers<[2], [1], [1], [2], [0, 0, 0, 1, 1, 2], [0], [0]>} : vector<4x8x32xf32>, vector<4x32x16xf32>, vector<4x8x16xf32> -> vector<4x8x16xf32>
    "tpu.trace_stop"() : () -> ()
    %c0_5 = arith.constant 0 : index
    %c0_6 = arith.constant 0 : index
    %c0_7 = arith.constant 0 : index
    %3 = vector.load %arg5[%c0_5, %c0_6, %c0_7] : memref<4x8x16xf32, #tpu.memory_space<vmem>>, vector<4x8x16xf32>
    tpu.vector_store %arg5[%c0_5, %c0_6, %c0_7], %2 {strides = array<i32>} : memref<4x8x16xf32, #tpu.memory_space<vmem>>, vector<4x8x16xf32>,
    return
  }
  func.func @transform_0(%arg0: i32, %arg1: i32, %arg2: i32) -> (i32, i32, i32) {
    %c0_i32 = arith.constant 0 : i32
    %c0_i32_0 = arith.constant 0 : i32
    return %arg0, %c0_i32, %arg2 : i32, i32, i32
  }
  func.func @transform_1(%arg0: i32, %arg1: i32, %arg2: i32) -> (i32, i32, i32) {
    %c0_i32 = arith.constant 0 : i32
    return %arg0, %arg2, %arg1 : i32, i32, i32
  }
  func.func @transform_2(%arg0: i32, %arg1: i32, %arg2: i32) -> (i32, i32, i32) {
    %c0_i32 = arith.constant 0 : i32
    %c0_i32_0 = arith.constant 0 : i32
    return %arg0, %c0_i32, %arg1 : i32, i32, i32
  }
}

</mosaic_0001>

<bundles_post_ra>
// kernel: tpu_custom_call.1
= control target key start
LH: loop header
LB: loop body
LE: loop exit
PB: predicated region body
PF: predicated region fallthrough
CT: control target
= control target key end

     0   :  { %vm32_vm0 = vcmask 261120   ;;  %s266_s0 = inlined_call_operand.vmem [shape: f32[4,8,32], index: 0, kind: input, shape index: {}]   ;;  %s267_s1 = inlined_call_operand.vmem [shape: f32[4,32,16], index: 1, kind: input, shape index: {}]   ;;  %s268_s2 = inlined_call_operand.hbm [shape: f32[4,8,16], index: 2, kind: output, shape index: {}]  }
   0x1   :  { %v27_v0 = vld [vmem:[%s267_s1 + $0x58] sm:$0xff]  ;;  %v26_v2 = vld [vmem:[%s267_s1 + $0x50] sm:$0xff]  ;;  %v25_v4 = vld [vmem:[%s267_s1 + $0x48] sm:$0xff] }
   0x2   :  { %v31_v1 = vld [vmem:[%s267_s1 + $0x78] sm:$0xff]  ;;  %94 = vmatpush.msra.mxu2 %v27_v0  ;;  %v30_v3 = vld [vmem:[%s267_s1 + $0x70] sm:$0xff]  ;;  %v29_v5 = vld [vmem:[%s267_s1 + $0x68] sm:$0xff] }
   0x3   :  { %117 = vmatpush.msra.mxu3 %v31_v1  ;;  %v19_v6 = vld [vmem:[%s267_s1 + $0x18] sm:$0xff]  ;;  %v24_v8 = vld [vmem:[%s267_s1 + $0x40] sm:$0xff]  ;;  %v18_v10 = vld [vmem:[%s267_s1 + $0x10] sm:$0xff] }
   0x4   :  { %v23_v7 = vld [vmem:[%s267_s1 + $0x38] sm:$0xff]  ;;  %95 = vmatpush.msra.mxu2 %v26_v2  ;;  %48 = vmatpush.msra.mxu0 %v19_v6  ;;  %v28_v9 = vld [vmem:[%s267_s1 + $0x60] sm:$0xff]  ;;  %v22_v11 = vld [vmem:[%s267_s1 + $0x30] sm:$0xff] }
   0x5   :  { %118 = vmatpush.msra.mxu3 %v30_v3  ;;  %71 = vmatpush.msra.mxu1 %v23_v7  ;;  %v14_v12 = vld [vmem:[%s266_s0 + $0x10] sm:$0xff]  ;;  %v15_v13 = vld [vmem:[%s266_s0 + $0x18] sm:$0xff]  ;;  %v17_v14 = vld [vmem:[%s267_s1 + $0x8] sm:$0xff] }
   0x6   :  { %96 = vmatpush.msra.mxu2 %v25_v4  ;;  %49 = vmatpush.msra.mxu0 %v18_v10  ;;  %v21_v15 = vld [vmem:[%s267_s1 + $0x28] sm:$0xff] }
   0x7   :  { %119 = vmatpush.msra.mxu3 %v29_v5  ;;  %72 = vmatpush.msra.mxu1 %v22_v11 }
   0x8   :  { %7 = vsyncpa [#allocation3], 0  ;;  %97 = vmatpush.msra.mxu2 %v24_v8  ;;  %v16_v16 = vld [vmem:[%s267_s1] sm:$0xff]  ;;  %50 = vmatpush.msra.mxu0 %v17_v14  ;;  %v13_v19 = vld [vmem:[%s266_s0 + $0x8] sm:$0xff]  ;;  %vm125_vm1 = vcmask 130048   ;;  %s181_s21 = smov [#allocation2]  }
   0x9   :  { %120 = vmatpush.msra.mxu3 %v28_v9  ;;  %150 = vmatmul.msk.f32.vlgmr.msra.gmra.mxu2 %vm32_vm0, %v14_v12  ;;  %v20_v17 = vld [vmem:[%s267_s1 + $0x20] sm:$0xff]  ;;  %s134_s22 = sshll.u32 %s181_s21, 4  ;;  %s136_s24 = sshll.u32 %s268_s2, 4  ;;  %s135_s22 = int_to_ptr.vmem [resolvable:$true] %s134_s22  ;;  %s137_s24 = int_to_ptr.hbm [resolvable:$true] %s136_s24 }
   0xa   :  { %151 = vmatmul.msk.f32.vlgmr.msra.gmra.mxu3 %vm32_vm0, %v15_v13  ;;  %73 = vmatpush.msra.mxu1 %v21_v15  ;;  %v12_v18 = vld [vmem:[%s266_s0] sm:$0xff]  ;;  %s182_s0 = smov 128   ;;  %s183_s25 = smov 8  }
   0xb   :  { %51 = vmatpush.msra.mxu0 %v16_v16 }
   0xc   :  { %74 = vmatpush.msra.mxu1 %v20_v17  ;;  %148 = vmatmul.msk.f32.vlgmr.msra.gmra.mxu0 %vm32_vm0, %v12_v18 }
   0xd   :  { %149 = vmatmul.msk.f32.vlgmr.msra.gmra.mxu1 %vm32_vm0, %v13_v19 }
  0x89   :  { %v53_v20 = vpop.f32.mrf.mxu0 }
  0x8a   :  { %v76_v21 = vpop.f32.mrf.mxu1  ;;  %126 = vst.msk [vmem:[#allocation2] sm:$0xff] %vm125_vm1, %v53_v20 }
  0x8b   :  { %127 = vst.msk [vmem:[#allocation2 + $0x8] sm:$0xff] %vm125_vm1, %v76_v21 }
  0x8c   :  { %v99_v22 = vpop.f32.mrf.mxu2 }
  0x8d   :  { %v122_v23 = vpop.f32.mrf.mxu3  ;;  %128 = vst.msk [vmem:[#allocation2 + $0x10] sm:$0xff] %vm125_vm1, %v99_v22 }
  0x8e   :  { %129 = vst.msk [vmem:[#allocation2 + $0x18] sm:$0xff] %vm125_vm1, %v122_v23 }
  0x8f   :  { %142 = dma.vmem_to_hbm [thread:$0]  %s135_s22, 512, %s137_s24, [#allocation3], %s182_s0, %s182_s0, %s183_s25  }
  0x90   :  { %179 = dma.done.wait [#allocation3], 512  }
  0x91   :  { %180 = vsyncadd [#allocation3], 4294966784 }
  0x92   :  { %147 = vsyncpa [#allocation3], 1 }

</bundles_post_ra>
